<compile_context>
chip_gen: v7x
topology: tpu7x:2x2x1
jax: 0.10.0
libtpu: 0.0.40
codegen_flags: <defaults>
</compile_context>

<pallas_src>
import math

import jax
import jax.numpy as jnp
from jax.experimental import pallas as pl
from jax.experimental.pallas import tpu as pltpu


def _round_up(a, b):
    return (a + b - 1) // b * b


def _sublane(dtype):
    # minimal sublane multiple: 8 for 32-bit, 16 for 16-bit, 32 for 8-bit dtypes
    itemsize = jnp.dtype(dtype).itemsize
    return max(8, 32 // max(1, itemsize))


def _pick_col_tile(lane_dim, cap=4096):
    """Largest multiple-of-128 divisor of lane_dim that is <= cap (else full width)."""
    if lane_dim <= cap:
        return lane_dim
    c = cap - cap % 128
    while c >= 128:
        if lane_dim % c == 0:
            return c
        c -= 128
    return lane_dim


def _rezero_vec_kernel(x_ref, y_ref, w_ref, o_ref):
    # x_ref, y_ref, o_ref: (TILE_ROWS, TILE_COLS); w_ref: (1, TILE_COLS)
    od = o_ref.dtype
    o_ref[...] = x_ref[...].astype(od) + y_ref[...].astype(od) * w_ref[...].astype(od)


def _rezero_scalar_kernel(x_ref, y_ref, w_ref, o_ref):
    # x_ref, y_ref, o_ref: (TILE_ROWS, TILE_COLS); w_ref: (1,) scalar in SMEM
    od = o_ref.dtype
    w = w_ref[0].astype(od)
    o_ref[...] = x_ref[...].astype(od) + y_ref[...].astype(od) * w


def rezero_forward(x, y, weights, *, target_tile_bytes=4 * 1024 * 1024):
    """out = x + y * weights.  weights: shape (1,) (simple) or (hidden,) (per-channel)."""
    assert x.shape == y.shape, "x and y must have the same shape"
    orig_shape = x.shape
    hidden = orig_shape[-1] if orig_shape else 1
    n_elems = math.prod(orig_shape) if orig_shape else 1

    w = jnp.asarray(weights).reshape(-1)
    scalar_w = w.shape[0] == 1
    if not scalar_w:
        assert w.shape[0] == hidden, "weights must be scalar or match hidden size"

    # PyTorch-style type promotion (do NOT downcast an fp32 gate to bf16).
    out_dtype = jnp.result_type(x.dtype, y.dtype, w.dtype)

    # ---- pick a lane-dense 2-D layout ------------------------------------
    if scalar_w:
        # Weight is uniform over all elements: flatten everything.
        lane_dim = min(1024, _round_up(max(n_elems, 1), 128))
        fold = 1
    else:
        # Fold several rows into the lane axis when hidden is small so the
        # output last dim is a large (ideally multiple-of-128) lane width.
        fold = 1 if hidden >= 512 else max(1, 512 // hidden)
        lane_dim = fold * hidden  # column c -> weight index (c % hidden)

    tile_cols = _pick_col_tile(lane_dim)
    n_col_tiles = lane_dim // tile_cols

    rows2 = max(1, pl.cdiv(n_elems, lane_dim))

    # dtype-aware sublane alignment and VMEM-budgeted row tile (~4 MiB / buffer)
    sub = max(_sublane(x.dtype), _sublane(y.dtype), _sublane(out_dtype))
    bytes_per_el = max(jnp.dtype(d).itemsize for d in (x.dtype, y.dtype, out_dtype))
    tile_rows = max(sub, (target_tile_bytes // (tile_cols * bytes_per_el)) // sub * sub)
    tile_rows = min(tile_rows, _round_up(rows2, sub))

    padded_rows = _round_up(rows2, tile_rows)
    n_row_tiles = padded_rows // tile_rows
    padded_len = padded_rows * lane_dim

    def to_2d(a):
        flat = a.reshape(-1)
        if padded_len != n_elems:
            flat = jnp.pad(flat, (0, padded_len - n_elems))
        return flat.reshape(padded_rows, lane_dim)

    x2 = to_2d(x)
    y2 = to_2d(y)

    data_spec = pl.BlockSpec((tile_rows, tile_cols), lambda i, j: (i, j))

    if scalar_w:
        kernel = _rezero_scalar_kernel
        w_arg = w.astype(jnp.float32)  # 32-bit scalar transport in SMEM (exact upcast)
        w_spec = pl.BlockSpec(memory_space=pltpu.MemorySpace.SMEM)
    else:
        kernel = _rezero_vec_kernel
        w_arg = jnp.tile(w, fold).reshape(1, lane_dim)  # lane-dense weight row
        w_spec = pl.BlockSpec((1, tile_cols), lambda i, j: (0, j))

    cost = pl.CostEstimate(
        flops=2 * n_elems,
        transcendentals=0,
        bytes_accessed=n_elems
        * (
            jnp.dtype(x.dtype).itemsize
            + jnp.dtype(y.dtype).itemsize
            + jnp.dtype(out_dtype).itemsize
        ),
    )

    out2 = pl.pallas_call(
        kernel,
        out_shape=jax.ShapeDtypeStruct((padded_rows, lane_dim), out_dtype),
        grid_spec=pltpu.PrefetchScalarGridSpec(
            num_scalar_prefetch=0,
            grid=(n_row_tiles, n_col_tiles),
            in_specs=[data_spec, data_spec, w_spec],
            out_specs=data_spec,
        ),
        compiler_params=pltpu.CompilerParams(
            dimension_semantics=("parallel", "parallel"),
            vmem_limit_bytes=48 * 1024 * 1024,
        ),
        cost_estimate=cost,
    )(x2, y2, w_arg)

    out_flat = out2.reshape(-1)
    if padded_len != n_elems:
        out_flat = out_flat[:n_elems]
    return out_flat.reshape(orig_shape)


if __name__ == "__main__":
    key = jax.random.PRNGKey(0)
    kx, ky, kx2, ky2 = jax.random.split(key, 4)

    batch, seq, hidden = 2, 8, 32
    x = jax.random.normal(kx, (batch, seq, hidden), dtype=jnp.float32)
    y = jax.random.normal(ky, (batch, seq, hidden), dtype=jnp.float32)

    # simple=True: scalar weight, initialized to fill=0.0 (torch.zeros(1) + fill)
    w_simple = jnp.full((1,), 0.0, dtype=jnp.float32)
    out_simple = jax.block_until_ready(rezero_forward(x, y, w_simple))
    ref_simple = x + y * w_simple
    assert out_simple.shape == x.shape
    assert jnp.allclose(out_simple, ref_simple, atol=1e-6)

    # simple=False: per-hidden weights with a nonzero fill so the multiply path is exercised
    w_vec = jnp.full((hidden,), 0.5, dtype=jnp.float32)
    out_vec = jax.block_until_ready(rezero_forward(x, y, w_vec))
    ref_vec = x + y * w_vec
    assert jnp.allclose(out_vec, ref_vec, atol=1e-6)

    # odd (non-dividing) shape to exercise the padding / lane-folding path
    xb = jax.random.normal(kx2, (3, 7, hidden), dtype=jnp.float32)
    yb = jax.random.normal(ky2, (3, 7, hidden), dtype=jnp.float32)
    w_vec2 = jax.random.normal(key, (hidden,), dtype=jnp.float32)
    out_odd = jax.block_until_ready(rezero_forward(xb, yb, w_vec2))
    ref_odd = xb + yb * w_vec2
    assert out_odd.shape == xb.shape
    assert jnp.allclose(out_odd, ref_odd, atol=1e-6)

    # scalar gate with a nonzero value as well
    w_s2 = jnp.full((1,), 0.25, dtype=jnp.float32)
    out_s2 = jax.block_until_ready(rezero_forward(xb, yb, w_s2))
    assert jnp.allclose(out_s2, xb + yb * w_s2, atol=1e-6)

    print("KERNEL_OK")
</pallas_src>

<mosaic_0001>
module attributes {stable_mosaic.version = 11 : i64} {
  func.func @_rezero_scalar_kernel(%arg0: i32, %arg1: i32, %arg2: memref<8x512xf32, #tpu.memory_space<vmem>>, %arg3: memref<8x512xf32, #tpu.memory_space<vmem>>, %arg4: memref<1xf32, #tpu.memory_space<smem>>, %arg5: memref<8x512xf32, #tpu.memory_space<vmem>>) attributes {dimension_semantics = [#tpu.dimension_semantics<parallel>, #tpu.dimension_semantics<parallel>], iteration_bounds = array<i64: 1, 1>, scalar_prefetch = 0 : i64, scratch_operands = 0 : i64, tpu.core_type = #tpu.core_type<tc>, window_params = [{transform_indices = @transform_0, window_bounds = array<i64: 8, 512>}, {transform_indices = @transform_1, window_bounds = array<i64: 8, 512>}, {transform_indices = @transform_2, window_bounds = array<i64: 1>}, {transform_indices = @transform_3, window_bounds = array<i64: 8, 512>}]} {
    %c0 = arith.constant 0 : index
    %0 = memref.load %arg4[%c0] : memref<1xf32, #tpu.memory_space<smem>>
    %c0_0 = arith.constant 0 : index
    %c0_1 = arith.constant 0 : index
    %1 = vector.load %arg2[%c0_0, %c0_1] : memref<8x512xf32, #tpu.memory_space<vmem>>, vector<8x512xf32>
    %c0_2 = arith.constant 0 : index
    %c0_3 = arith.constant 0 : index
    %2 = vector.load %arg3[%c0_2, %c0_3] : memref<8x512xf32, #tpu.memory_space<vmem>>, vector<8x512xf32>
    %3 = vector.broadcast %0 : f32 to vector<8x512xf32>
    %4 = arith.mulf %2, %3 : vector<8x512xf32>
    %5 = arith.addf %1, %4 : vector<8x512xf32>
    %c0_4 = arith.constant 0 : index
    %c0_5 = arith.constant 0 : index
    %6 = vector.load %arg5[%c0_4, %c0_5] : memref<8x512xf32, #tpu.memory_space<vmem>>, vector<8x512xf32>
    tpu.vector_store %arg5[%c0_4, %c0_5], %5 {strides = array<i32>} : memref<8x512xf32, #tpu.memory_space<vmem>>, vector<8x512xf32>,
    return
  }
  func.func @transform_0(%arg0: i32, %arg1: i32) -> (i32, i32) {
    %c0_i32 = arith.constant 0 : i32
    return %arg0, %arg1 : i32, i32
  }
  func.func @transform_1(%arg0: i32, %arg1: i32) -> (i32, i32) {
    %c0_i32 = arith.constant 0 : i32
    return %arg0, %arg1 : i32, i32
  }
  func.func @transform_2(%arg0: i32, %arg1: i32) -> i32 {
    %c0_i32 = arith.constant 0 : i32
    %c0_i32_0 = arith.constant 0 : i32
    return %c0_i32 : i32
  }
  func.func @transform_3(%arg0: i32, %arg1: i32) -> (i32, i32) {
    %c0_i32 = arith.constant 0 : i32
    return %arg0, %arg1 : i32, i32
  }
}

</mosaic_0001>

<bundles_post_ra>
// kernel: tpu_custom_call.1
= control target key start
LH: loop header
LB: loop body
LE: loop exit
PB: predicated region body
PF: predicated region fallthrough
CT: control target
= control target key end

     0   :  { %9 = vsyncpa [#allocation4], 0  ;;  %s215_s0 = inlined_call_operand.hbm [shape: f32[8,512], index: 0, kind: input, shape index: {}]   ;;  %s216_s1 = inlined_call_operand.hbm [shape: f32[8,512], index: 1, kind: input, shape index: {}]   ;;  %s217_s2 = inlined_call_operand.<no memory space> [shape: f32[1], index: 2, kind: input, shape index: {}]   ;;  %s218_s3 = inlined_call_operand.hbm [shape: f32[8,512], index: 3, kind: output, shape index: {}]  }
   0x1   :  { %10 = vsyncpa [#allocation7], 0 }
   0x2   :  { %11 = vsyncpa [#allocation5], 0  ;;  %s153_s12 = smov [#allocation3]   ;;  %s154_s14 = smov [#allocation6]  }
   0x3   :  { %s18_s13 = sshll.u32 %s153_s12, 4  ;;  %s28_s15 = sshll.u32 %s154_s14, 4  ;;  %s19_s13 = int_to_ptr.vmem [resolvable:$true] %s18_s13  ;;  %s29_s15 = int_to_ptr.vmem [resolvable:$true] %s28_s15 }
   0x4   :  { %s81_s18 = scalar_lea.hbm %s215_s0, 512 }
   0x5   :  { %p82_p0 = scmp.ne.s32.totalorder %s215_s0, %s81_s18  ;;  %p85_p1 = scmp.lt.u32.totalorder %s81_s18, %s215_s0 }
   0x7   :  { %p87_p2 = pnand %p85_p1, %p82_p0 }
   0x9   :  { %90 = shalt.err (!%p87_p2)
}
   0xa   :  { %s91_s23 = scalar_lea.vmem %s19_s13, 512  ;;  %p96_p4 = scmp.lt.s32.totalorder %s19_s13, %s19_s13 }
   0xb   :  { %p92_p3 = scmp.ne.s32.totalorder %s19_s13, %s91_s23  ;;  %p97_p5 = scmp.lt.s32.totalorder %s91_s23, %s91_s23 }
   0xd   :  { %p98_p6 = por %p97_p5, %p96_p4 }
   0xf   :  { %p99_p7 = pnand %p98_p6, %p92_p3 }
  0x11   :  { %102 = shalt.err (!%p99_p7)
}
  0x12   :  { %21 = dma.hbm_to_vmem [thread:$0]  %s215_s0, 512, %s19_s13, [#allocation4]  }
  0x13   :  { %s103_s28 = scalar_lea.hbm %s216_s1, 512 }
  0x14   :  { %p104_p8 = scmp.ne.s32.totalorder %s216_s1, %s103_s28  ;;  %p107_p9 = scmp.lt.u32.totalorder %s103_s28, %s216_s1 }
  0x16   :  { %p109_p10 = pnand %p107_p9, %p104_p8 }
  0x18   :  { %112 = shalt.err (!%p109_p10)
}
  0x19   :  { %s113_s6 = scalar_lea.vmem %s29_s15, 512  ;;  %p118_p12 = scmp.lt.s32.totalorder %s29_s15, %s29_s15 }
  0x1a   :  { %p114_p11 = scmp.ne.s32.totalorder %s29_s15, %s113_s6  ;;  %p119_p13 = scmp.lt.s32.totalorder %s113_s6, %s113_s6 }
  0x1c   :  { %p120_p0 = por %p119_p13, %p118_p12 }
  0x1e   :  { %p121_p1 = pnand %p120_p0, %p114_p11 }
  0x20   :  { %124 = shalt.err (!%p121_p1)
}
  0x21   :  { %31 = dma.hbm_to_vmem [thread:$0]  %s216_s1, 512, %s29_s15, [#allocation7]  }
  0x22   :  { %147 = dma.done.wait [#allocation4], 512  }
  0x23   :  { %148 = vsyncadd [#allocation4], 4294966784 }
  0x24   :  { %149 = dma.done.wait [#allocation7], 512  }
  0x25   :  { %150 = vsyncadd [#allocation7], 4294966784  ;;  %v49_v0 = vstv %s217_s2  ;;  %v41_v1 = vld [vmem:[#allocation3] sm:$0xff]  ;;  %v42_v3 = vld [vmem:[#allocation3 + $0x8] sm:$0xff]  ;;  %s155_s1 = smov [#allocation8]  }
  0x26   :  { %v45_v2 = vld [vmem:[#allocation6] sm:$0xff]  ;;  %v46_v5 = vld [vmem:[#allocation6 + $0x8] sm:$0xff]  ;;  %v43_v6 = vld [vmem:[#allocation3 + $0x10] sm:$0xff]  ;;  %s68_s10 = sshll.u32 %s155_s1, 4  ;;  %s69_s10 = int_to_ptr.vmem [resolvable:$true] %s68_s10 }
  0x27   :  { %v50_v4 = vmul.f32 %v49_v0, %v45_v2  ;;  %v47_v7 = vld [vmem:[#allocation6 + $0x10] sm:$0xff]  ;;  %v51_v8 = vmul.f32 %v49_v0, %v46_v5  ;;  %v44_v10 = vld [vmem:[#allocation3 + $0x18] sm:$0xff]  ;;  %s125_s2 = scalar_lea.vmem %s69_s10, 512  ;;  %p130_p3 = scmp.lt.s32.totalorder %s69_s10, %s69_s10 }
  0x28   :  { %v52_v9 = vmul.f32 %v49_v0, %v47_v7  ;;  %v48_v11 = vld [vmem:[#allocation6 + $0x18] sm:$0xff]  ;;  %p126_p2 = scmp.ne.s32.totalorder %s69_s10, %s125_s2  ;;  %p131_p4 = scmp.lt.s32.totalorder %s125_s2, %s125_s2 }
  0x29   :  { %v54_v12 = vadd.f32 %v50_v4, %v41_v1  ;;  %v53_v13 = vmul.f32 %v49_v0, %v48_v11  ;;  %v55_v14 = vadd.f32 %v51_v8, %v42_v3 }
  0x2a   :  { %v56_v15 = vadd.f32 %v52_v9, %v43_v6  ;;  %p132_p5 = por %p131_p4, %p130_p3 }
  0x2b   :  { %58 = vst [vmem:[#allocation8] sm:$0xff] %v54_v12  ;;  %v57_v16 = vadd.f32 %v53_v13, %v44_v10  ;;  %59 = vst [vmem:[#allocation8 + $0x8] sm:$0xff] %v55_v14 }
  0x2c   :  { %60 = vst [vmem:[#allocation8 + $0x10] sm:$0xff] %v56_v15  ;;  %p133_p6 = pnand %p132_p5, %p126_p2 }
  0x2d   :  { %61 = vst [vmem:[#allocation8 + $0x18] sm:$0xff] %v57_v16 }
  0x2e   :  { %136 = shalt.err (!%p133_p6)
}
  0x2f   :  { %s137_s13 = scalar_lea.hbm %s218_s3, 512 }
  0x30   :  { %p138_p7 = scmp.ne.s32.totalorder %s218_s3, %s137_s13  ;;  %p141_p8 = scmp.lt.u32.totalorder %s137_s13, %s218_s3 }
  0x32   :  { %p143_p9 = pnand %p141_p8, %p138_p7 }
  0x34   :  { %146 = shalt.err (!%p143_p9)
}
  0x35   :  { %71 = dma.vmem_to_hbm [thread:$0]  %s69_s10, 512, %s218_s3, [#allocation5]  }
  0x36   :  { %151 = dma.done.wait [#allocation5], 512  }
  0x37   :  { %152 = vsyncadd [#allocation5], 4294966784 }
  0x38   :  { %75 = vsyncpa [#allocation4], 1 }
  0x39   :  { %76 = vsyncpa [#allocation7], 1 }
  0x3a   :  { %77 = vsyncpa [#allocation5], 1 }

</bundles_post_ra>
